<compile_context>
chip_gen: v5e
topology: v5e:2x2
jax: 0.10.0
libtpu: 0.0.40
codegen_flags: <defaults>
</compile_context>

<pallas_src>
import jax
import jax.numpy as jnp
from jax.experimental import pallas as pl
from jax.experimental.pallas import tpu as pltpu

# ---------------- problem sizes (small, lane-friendly) ----------------
B, C, H_IMG, W_IMG = 2, 4, 16, 16
D_IN  = C * H_IMG * W_IMG          # 1024
HID   = 128
Z_DIM = 16


def _round_up(n, m):
    return ((n + m - 1) // m) * m


def _batch_tile(b):
    """Per-generation batch tile: 256 cap on v5e (128-wide MXU), 512 otherwise."""
    b8 = _round_up(max(b, 1), 8)
    try:
        kind = jax.devices()[0].device_kind.lower()
    except Exception:
        kind = ""
    cap = 256 if "v5" in kind else 512
    return min(cap, b8)


# ---------------- fused Pallas kernel ----------------
def _vae_kernel(x_ref, eps_ref,
                w1_ref, b1_ref, whead_ref, bhead_ref,
                w3_ref, b3_ref, w4_ref, b4_ref,
                head_ref, xrec_ref):
    # ---- encoder hidden layer (bf16 MXU matmul, f32 accumulate + VPU relu) ----
    h = jnp.dot(x_ref[...], w1_ref[...], preferred_element_type=jnp.float32)
    h = jnp.maximum(h + b1_ref[...], 0.0)

    # ---- merged loc / log-scale heads: one MXU matmul for both ----
    head = jnp.dot(h.astype(jnp.bfloat16), whead_ref[...],
                   preferred_element_type=jnp.float32) + bhead_ref[...]
    exp_head = jnp.exp(head)                 # EUP exp on all 32 lanes (free slot)

    # single full-block store of the packed (loc | scale) slab
    col = jax.lax.broadcasted_iota(jnp.int32, head.shape, dimension=1)
    head_ref[...] = jnp.where(col < Z_DIM, head, exp_head)

    loc = head[:, :Z_DIM]
    scale = exp_head[:, Z_DIM:]

    # ---- reparameterize: z stays in VMEM, never round-trips through HBM ----
    z = loc + scale * eps_ref[...]

    # ---- decoder ----
    h2 = jnp.dot(z.astype(jnp.bfloat16), w3_ref[...],
                 preferred_element_type=jnp.float32)
    h2 = jnp.maximum(h2 + b3_ref[...], 0.0)
    logits = jnp.dot(h2.astype(jnp.bfloat16), w4_ref[...],
                     preferred_element_type=jnp.float32) + b4_ref[...]
    xrec_ref[...] = jax.nn.sigmoid(logits).astype(xrec_ref.dtype)


# ---------------- wrapper ----------------
def vae_forward(x_nchw, params, eps):
    """Mirrors VAE.forward: returns (x_rec, z_loc, z_scale)."""
    b = x_nchw.shape[0]
    # NCHW -> [B, C*H*W], streamed to the kernel in bf16 (MXU input dtype).
    x2d = x_nchw.reshape(b, D_IN).astype(jnp.bfloat16)

    bt = _batch_tile(b)
    b_pad = _round_up(b, bt)
    pad = b_pad - b
    if pad:
        x2d = jnp.pad(x2d, ((0, pad), (0, 0)))
        eps_p = jnp.pad(eps, ((0, pad), (0, 0)))
    else:
        eps_p = eps

    # Note: at tiny B the grid is (1,) and v7x's second TensorCore idles; with a
    # large batch the grid splits across both TCs via dimension_semantics.
    grid = (b_pad // bt,)

    def act_spec(n):                       # streamed activation tiles
        return pl.BlockSpec((bt, n), lambda i: (i, 0))

    def res_spec(shape):                   # resident weights/biases (loaded once)
        return pl.BlockSpec(shape, lambda i: (0, 0))

    head_out, xrec = pl.pallas_call(
        _vae_kernel,
        grid=grid,
        in_specs=[
            act_spec(D_IN),                 # x tile      (bf16)
            act_spec(Z_DIM),                # eps tile    (f32)
            res_spec((D_IN, HID)),          # enc_w1      (bf16)
            res_spec((1, HID)),             # enc_b1      (f32)
            res_spec((HID, 2 * Z_DIM)),     # enc_whead   (bf16, loc|log-scale)
            res_spec((1, 2 * Z_DIM)),       # enc_bhead   (f32)
            res_spec((Z_DIM, HID)),         # dec_w3      (bf16)
            res_spec((1, HID)),             # dec_b3      (f32)
            res_spec((HID, D_IN)),          # dec_w4      (bf16)
            res_spec((1, D_IN)),            # dec_b4      (f32)
        ],
        out_specs=(act_spec(2 * Z_DIM), act_spec(D_IN)),
        out_shape=(
            jax.ShapeDtypeStruct((b_pad, 2 * Z_DIM), jnp.float32),   # loc|scale
            jax.ShapeDtypeStruct((b_pad, D_IN), jnp.bfloat16),       # x_rec
        ),
        compiler_params=pltpu.CompilerParams(
            dimension_semantics=("parallel",),     # batch tiles across TCs on v7x
            vmem_limit_bytes=32 * 1024 * 1024,     # headroom for bt up to 512
        ),
    )(x2d, eps_p,
      params["enc_w1"], params["enc_b1"],
      params["enc_whead"], params["enc_bhead"],
      params["dec_w3"], params["dec_b3"],
      params["dec_w4"], params["dec_b4"])

    z_loc = head_out[:b, :Z_DIM]
    z_scale = head_out[:b, Z_DIM:]
    x_rec = xrec[:b].reshape(b, C, H_IMG, W_IMG)          # back to NCHW (bf16)
    return x_rec, z_loc, z_scale


# ---------------- deterministic parameter init ----------------
def init_params(key):
    ks = jax.random.split(key, 4)
    s = 0.02
    return {
        "enc_w1":    (s * jax.random.normal(ks[0], (D_IN, HID))).astype(jnp.bfloat16),
        "enc_b1":    jnp.zeros((1, HID), jnp.float32),
        # loc head and log-scale head concatenated along the output dim
        "enc_whead": (s * jax.random.normal(ks[1], (HID, 2 * Z_DIM))).astype(jnp.bfloat16),
        "enc_bhead": jnp.zeros((1, 2 * Z_DIM), jnp.float32),
        "dec_w3":    (s * jax.random.normal(ks[2], (Z_DIM, HID))).astype(jnp.bfloat16),
        "dec_b3":    jnp.zeros((1, HID), jnp.float32),
        "dec_w4":    (s * jax.random.normal(ks[3], (HID, D_IN))).astype(jnp.bfloat16),
        "dec_b4":    jnp.zeros((1, D_IN), jnp.float32),
    }


if __name__ == "__main__":
    key = jax.random.PRNGKey(0)
    k_x, k_eps, k_p = jax.random.split(key, 3)

    x = jax.random.normal(k_x, (B, C, H_IMG, W_IMG), jnp.float32)
    eps = jax.random.normal(k_eps, (B, Z_DIM), jnp.float32)
    params = init_params(k_p)

    x_rec, z_loc, z_scale = jax.jit(vae_forward)(x, params, eps)
    jax.block_until_ready((x_rec, z_loc, z_scale))

    assert x_rec.shape == (B, C, H_IMG, W_IMG)
    assert z_loc.shape == (B, Z_DIM) and z_scale.shape == (B, Z_DIM)
    assert bool(jnp.all(jnp.isfinite(x_rec.astype(jnp.float32))))
    assert bool(jnp.all(z_scale > 0.0))
    print("KERNEL_OK")
</pallas_src>

<mosaic_0001>
module attributes {stable_mosaic.version = 11 : i64} {
  func.func @_vae_kernel(%arg0: i32, %arg1: memref<8x1024xbf16, #tpu.memory_space<vmem>>, %arg2: memref<8x16xf32, #tpu.memory_space<vmem>>, %arg3: memref<1024x128xbf16, #tpu.memory_space<vmem>>, %arg4: memref<1x128xf32, #tpu.memory_space<vmem>>, %arg5: memref<128x32xbf16, #tpu.memory_space<vmem>>, %arg6: memref<1x32xf32, #tpu.memory_space<vmem>>, %arg7: memref<16x128xbf16, #tpu.memory_space<vmem>>, %arg8: memref<1x128xf32, #tpu.memory_space<vmem>>, %arg9: memref<128x1024xbf16, #tpu.memory_space<vmem>>, %arg10: memref<1x1024xf32, #tpu.memory_space<vmem>>, %arg11: memref<8x32xf32, #tpu.memory_space<vmem>>, %arg12: memref<8x1024xbf16, #tpu.memory_space<vmem>>) attributes {dimension_semantics = [#tpu.dimension_semantics<parallel>], iteration_bounds = array<i64: 1>, scalar_prefetch = 0 : i64, scratch_operands = 0 : i64, tpu.core_type = #tpu.core_type<tc>, window_params = [{transform_indices = @transform_0, window_bounds = array<i64: 8, 1024>}, {transform_indices = @transform_1, window_bounds = array<i64: 8, 16>}, {pipeline_mode = #tpu.pipeline_mode<synchronous>, transform_indices = @transform_2, window_bounds = array<i64: 1024, 128>}, {pipeline_mode = #tpu.pipeline_mode<synchronous>, transform_indices = @transform_3, window_bounds = array<i64: 1, 128>}, {pipeline_mode = #tpu.pipeline_mode<synchronous>, transform_indices = @transform_4, window_bounds = array<i64: 128, 32>}, {pipeline_mode = #tpu.pipeline_mode<synchronous>, transform_indices = @transform_5, window_bounds = array<i64: 1, 32>}, {pipeline_mode = #tpu.pipeline_mode<synchronous>, transform_indices = @transform_6, window_bounds = array<i64: 16, 128>}, {pipeline_mode = #tpu.pipeline_mode<synchronous>, transform_indices = @transform_7, window_bounds = array<i64: 1, 128>}, {pipeline_mode = #tpu.pipeline_mode<synchronous>, transform_indices = @transform_8, window_bounds = array<i64: 128, 1024>}, {pipeline_mode = #tpu.pipeline_mode<synchronous>, transform_indices = @transform_9, window_bounds = array<i64: 1, 1024>}, {transform_indices = @transform_10, window_bounds = array<i64: 8, 32>}, {transform_indices = @transform_11, window_bounds = array<i64: 8, 1024>}]} {
    %c0 = arith.constant 0 : index
    %c0_0 = arith.constant 0 : index
    %0 = vector.load %arg1[%c0, %c0_0] : memref<8x1024xbf16, #tpu.memory_space<vmem>>, vector<8x1024xbf16>
    %c0_1 = arith.constant 0 : index
    %c0_2 = arith.constant 0 : index
    %1 = vector.load %arg3[%c0_1, %c0_2] : memref<1024x128xbf16, #tpu.memory_space<vmem>>, vector<1024x128xbf16>
    %cst = arith.constant dense<0.000000e+00> : vector<8x128xf32>
    %2 = tpu.matmul %0, %1, %cst {dimension_numbers = #tpu.dot_dimension_numbers<[1], [0], [0], [1], [0, 0, 1, 1], [], []>} : vector<8x1024xbf16>, vector<1024x128xbf16>, vector<8x128xf32> -> vector<8x128xf32>
    %c0_3 = arith.constant 0 : index
    %c0_4 = arith.constant 0 : index
    %3 = vector.load %arg4[%c0_3, %c0_4] : memref<1x128xf32, #tpu.memory_space<vmem>>, vector<1x128xf32>
    %4 = vector.broadcast %3 : vector<1x128xf32> to vector<8x128xf32>
    %5 = arith.addf %2, %4 : vector<8x128xf32>
    %cst_5 = arith.constant 0.000000e+00 : f32
    %6 = vector.broadcast %cst_5 : f32 to vector<8x128xf32>
    %7 = arith.maximumf %5, %6 : vector<8x128xf32>
    %8 = arith.truncf %7 : vector<8x128xf32> to vector<8x128xbf16>
    %c0_6 = arith.constant 0 : index
    %c0_7 = arith.constant 0 : index
    %9 = vector.load %arg5[%c0_6, %c0_7] : memref<128x32xbf16, #tpu.memory_space<vmem>>, vector<128x32xbf16>
    %cst_8 = arith.constant dense<0.000000e+00> : vector<8x32xf32>
    %10 = tpu.matmul %8, %9, %cst_8 {dimension_numbers = #tpu.dot_dimension_numbers<[1], [0], [0], [1], [0, 0, 1, 1], [], []>} : vector<8x128xbf16>, vector<128x32xbf16>, vector<8x32xf32> -> vector<8x32xf32>
    %c0_9 = arith.constant 0 : index
    %c0_10 = arith.constant 0 : index
    %11 = vector.load %arg6[%c0_9, %c0_10] : memref<1x32xf32, #tpu.memory_space<vmem>>, vector<1x32xf32>
    %12 = vector.broadcast %11 : vector<1x32xf32> to vector<8x32xf32>
    %13 = arith.addf %10, %12 : vector<8x32xf32>
    %14 = math.exp %13 : vector<8x32xf32>
    %15 = tpu.iota {dimensions = array<i32: 1>} : vector<8x32xi32>
    %c16_i32 = arith.constant 16 : i32
    %16 = vector.broadcast %c16_i32 : i32 to vector<8x32xi32>
    %17 = arith.cmpi slt, %15, %16 : vector<8x32xi32>
    %18 = arith.select %17, %13, %14 : vector<8x32xi1>, vector<8x32xf32>
    %c0_11 = arith.constant 0 : index
    %c0_12 = arith.constant 0 : index
    %19 = vector.load %arg11[%c0_11, %c0_12] : memref<8x32xf32, #tpu.memory_space<vmem>>, vector<8x32xf32>
    tpu.vector_store %arg11[%c0_11, %c0_12], %18 {strides = array<i32>} : memref<8x32xf32, #tpu.memory_space<vmem>>, vector<8x32xf32>,
    %20 = vector.extract_strided_slice %13 {offsets = [0, 0], sizes = [8, 16], strides = [1, 1]} : vector<8x32xf32> to vector<8x16xf32>
    %21 = vector.extract_strided_slice %14 {offsets = [0, 16], sizes = [8, 16], strides = [1, 1]} : vector<8x32xf32> to vector<8x16xf32>
    %c0_13 = arith.constant 0 : index
    %c0_14 = arith.constant 0 : index
    %22 = vector.load %arg2[%c0_13, %c0_14] : memref<8x16xf32, #tpu.memory_space<vmem>>, vector<8x16xf32>
    %23 = arith.mulf %21, %22 : vector<8x16xf32>
    %24 = arith.addf %20, %23 : vector<8x16xf32>
    %25 = arith.truncf %24 : vector<8x16xf32> to vector<8x16xbf16>
    %c0_15 = arith.constant 0 : index
    %c0_16 = arith.constant 0 : index
    %26 = vector.load %arg7[%c0_15, %c0_16] : memref<16x128xbf16, #tpu.memory_space<vmem>>, vector<16x128xbf16>
    %cst_17 = arith.constant dense<0.000000e+00> : vector<8x128xf32>
    %27 = tpu.matmul %25, %26, %cst_17 {dimension_numbers = #tpu.dot_dimension_numbers<[1], [0], [0], [1], [0, 0, 1, 1], [], []>} : vector<8x16xbf16>, vector<16x128xbf16>, vector<8x128xf32> -> vector<8x128xf32>
    %c0_18 = arith.constant 0 : index
    %c0_19 = arith.constant 0 : index
    %28 = vector.load %arg8[%c0_18, %c0_19] : memref<1x128xf32, #tpu.memory_space<vmem>>, vector<1x128xf32>
    %29 = vector.broadcast %28 : vector<1x128xf32> to vector<8x128xf32>
    %30 = arith.addf %27, %29 : vector<8x128xf32>
    %cst_20 = arith.constant 0.000000e+00 : f32
    %31 = vector.broadcast %cst_20 : f32 to vector<8x128xf32>
    %32 = arith.maximumf %30, %31 : vector<8x128xf32>
    %33 = arith.truncf %32 : vector<8x128xf32> to vector<8x128xbf16>
    %c0_21 = arith.constant 0 : index
    %c0_22 = arith.constant 0 : index
    %34 = vector.load %arg9[%c0_21, %c0_22] : memref<128x1024xbf16, #tpu.memory_space<vmem>>, vector<128x1024xbf16>
    %cst_23 = arith.constant dense<0.000000e+00> : vector<8x1024xf32>
    %35 = tpu.matmul %33, %34, %cst_23 {dimension_numbers = #tpu.dot_dimension_numbers<[1], [0], [0], [1], [0, 0, 1, 1], [], []>} : vector<8x128xbf16>, vector<128x1024xbf16>, vector<8x1024xf32> -> vector<8x1024xf32>
    %c0_24 = arith.constant 0 : index
    %c0_25 = arith.constant 0 : index
    %36 = vector.load %arg10[%c0_24, %c0_25] : memref<1x1024xf32, #tpu.memory_space<vmem>>, vector<1x1024xf32>
    %37 = vector.broadcast %36 : vector<1x1024xf32> to vector<8x1024xf32>
    %38 = arith.addf %35, %37 : vector<8x1024xf32>
    %39 = arith.negf %38 : vector<8x1024xf32>
    %40 = math.exp %39 : vector<8x1024xf32>
    %cst_26 = arith.constant 1.000000e+00 : f32
    %41 = vector.broadcast %cst_26 : f32 to vector<8x1024xf32>
    %42 = arith.addf %41, %40 : vector<8x1024xf32>
    %43 = arith.divf %41, %42 : vector<8x1024xf32>
    %44 = arith.truncf %43 : vector<8x1024xf32> to vector<8x1024xbf16>
    %c0_27 = arith.constant 0 : index
    %c0_28 = arith.constant 0 : index
    %45 = vector.load %arg12[%c0_27, %c0_28] : memref<8x1024xbf16, #tpu.memory_space<vmem>>, vector<8x1024xbf16>
    tpu.vector_store %arg12[%c0_27, %c0_28], %44 {strides = array<i32>} : memref<8x1024xbf16, #tpu.memory_space<vmem>>, vector<8x1024xbf16>,
    return
  }
  func.func @transform_0(%arg0: i32) -> (i32, i32) {
    %c0_i32 = arith.constant 0 : i32
    %c0_i32_0 = arith.constant 0 : i32
    return %arg0, %c0_i32 : i32, i32
  }
  func.func @transform_1(%arg0: i32) -> (i32, i32) {
    %c0_i32 = arith.constant 0 : i32
    %c0_i32_0 = arith.constant 0 : i32
    return %arg0, %c0_i32 : i32, i32
  }
  func.func @transform_2(%arg0: i32) -> (i32, i32) {
    %c0_i32 = arith.constant 0 : i32
    %c0_i32_0 = arith.constant 0 : i32
    %c0_i32_1 = arith.constant 0 : i32
    return %c0_i32, %c0_i32_0 : i32, i32
  }
  func.func @transform_3(%arg0: i32) -> (i32, i32) {
    %c0_i32 = arith.constant 0 : i32
    %c0_i32_0 = arith.constant 0 : i32
    %c0_i32_1 = arith.constant 0 : i32
    return %c0_i32, %c0_i32_0 : i32, i32
  }
  func.func @transform_4(%arg0: i32) -> (i32, i32) {
    %c0_i32 = arith.constant 0 : i32
    %c0_i32_0 = arith.constant 0 : i32
    %c0_i32_1 = arith.constant 0 : i32
    return %c0_i32, %c0_i32_0 : i32, i32
  }
  func.func @transform_5(%arg0: i32) -> (i32, i32) {
    %c0_i32 = arith.constant 0 : i32
    %c0_i32_0 = arith.constant 0 : i32
    %c0_i32_1 = arith.constant 0 : i32
    return %c0_i32, %c0_i32_0 : i32, i32
  }
  func.func @transform_6(%arg0: i32) -> (i32, i32) {
    %c0_i32 = arith.constant 0 : i32
    %c0_i32_0 = arith.constant 0 : i32
    %c0_i32_1 = arith.constant 0 : i32
    return %c0_i32, %c0_i32_0 : i32, i32
  }
  func.func @transform_7(%arg0: i32) -> (i32, i32) {
    %c0_i32 = arith.constant 0 : i32
    %c0_i32_0 = arith.constant 0 : i32
    %c0_i32_1 = arith.constant 0 : i32
    return %c0_i32, %c0_i32_0 : i32, i32
  }
  func.func @transform_8(%arg0: i32) -> (i32, i32) {
    %c0_i32 = arith.constant 0 : i32
    %c0_i32_0 = arith.constant 0 : i32
    %c0_i32_1 = arith.constant 0 : i32
    return %c0_i32, %c0_i32_0 : i32, i32
  }
  func.func @transform_9(%arg0: i32) -> (i32, i32) {
    %c0_i32 = arith.constant 0 : i32
    %c0_i32_0 = arith.constant 0 : i32
    %c0_i32_1 = arith.constant 0 : i32
    return %c0_i32, %c0_i32_0 : i32, i32
  }
  func.func @transform_10(%arg0: i32) -> (i32, i32) {
    %c0_i32 = arith.constant 0 : i32
    %c0_i32_0 = arith.constant 0 : i32
    return %arg0, %c0_i32 : i32, i32
  }
  func.func @transform_11(%arg0: i32) -> (i32, i32) {
    %c0_i32 = arith.constant 0 : i32
    %c0_i32_0 = arith.constant 0 : i32
    return %arg0, %c0_i32 : i32, i32
  }
}

</mosaic_0001>

<bundles_post_ra>
// kernel: vae_forward.1
= control target key start
LH: loop header
LB: loop body
LE: loop exit
PB: predicated region body
PF: predicated region fallthrough
CT: control target
= control target key end

     0   :  { %17 = vsyncpa [#allocation3], 0  ;;  %s2531_s0 = inlined_call_operand.vmem [shape: bf16[8,1024], index: 0, kind: input, shape index: {}]   ;;  %s2532_s1 = inlined_call_operand.vmem [shape: f32[8,16], index: 1, kind: input, shape index: {}]   ;;  %s2533_s2 = inlined_call_operand.hbm [shape: bf16[1024,128], index: 2, kind: input, shape index: {}]   ;;  %s2534_s3 = inlined_call_operand.vmem [shape: f32[1,128], index: 3, kind: input, shape index: {}]   ;;  %s2535_s4 = inlined_call_operand.vmem [shape: bf16[128,32], index: 4, kind: input, shape index: {}]   ;;  %s2536_s5 = inlined_call_operand.vmem [shape: f32[1,32], index: 5, kind: input, shape index: {}]   ;;  %s2537_s6 = inlined_call_operand.vmem [shape: bf16[16,128], index: 6, kind: input, shape index: {}]   ;;  %s2538_s7 = inlined_call_operand.vmem [shape: f32[1,128], index: 7, kind: input, shape index: {}]   ;;  %s2539_s8 = inlined_call_operand.hbm [shape: bf16[128,1024], index: 8, kind: input, shape index: {}]   ;;  %s2540_s9 = inlined_call_operand.vmem [shape: f32[1,1024], index: 9, kind: input, shape index: {}]   ;;  %s2541_s10 = inlined_call_operand.vmem [shape: f32[8,32], index: 10, kind: output, shape index: {0}]   ;;  %s2542_s11 = inlined_call_operand.vmem [shape: bf16[8,1024], index: 11, kind: output, shape index: {1}]  }
   0x1   :  { %s27_s19 = sshll.u32 %s2533_s2, 4  ;;  %s28_s19 = int_to_ptr.hbm [resolvable:$true] %s27_s19 }
   0x2   :  { %18 = vsyncpa [#allocation5], 0  ;;  %s2323_s20 = smov [#allocation2]   ;;  %s50_s24 = sshll.u32 %s2539_s8, 4  ;;  %s51_s24 = int_to_ptr.hbm [resolvable:$true] %s50_s24 }
   0x3   :  { %s29_s21 = sshll.u32 %s2323_s20, 4  ;;  %s2324_s25 = smov 64   ;;  %s30_s21 = int_to_ptr.vmem [resolvable:$true] %s29_s21 }
   0x4   :  { %s2325_s26 = smov 4   ;;  %s2326_s27 = smov [#allocation4]  }
   0x5   :  { %35 = dma.hbm_to_vmem [thread:$0]  %s28_s19, 8192, %s30_s21, [#allocation3], %s2324_s25, %s2324_s25, %s2325_s26  }
   0x6   :  { %s52_s28 = sshll.u32 %s2326_s27, 4  ;;  %s2327_s29 = smov 512   ;;  %s53_s28 = int_to_ptr.vmem [resolvable:$true] %s52_s28 }
   0x7   :  { %s2328_s30 = smov 32  }
   0x8   :  { %58 = dma.hbm_to_vmem [thread:$0]  %s51_s24, 8192, %s53_s28, [#allocation5], %s2327_s29, %s2327_s29, %s2328_s30  }
   0x9   :  { %2319 = dma.done.wait [#allocation3], 8192  }
   0xa   :  { %2320 = vsyncadd [#allocation3], 4294959104 }
   0xb   :  { %2321 = dma.done.wait [#allocation5], 8192  }
   0xc   :  { %2322 = vsyncadd [#allocation5], 4294959104  ;;  %v2096_v0 = vld [vmem:[#allocation2 + $0x38] sm:$0xff]  ;;  %v2095_v4 = vld [vmem:[#allocation2 + $0x30] sm:$0xff]  ;;  %s2329_s16 = smov 16   ;;  %vm811_vm1 = vcmask 261120  }
   0xd   :  { %v2104_v1 = vld [vmem:[#allocation2 + $0x78] sm:$0xff]  ;;  %618 = vmatpush.bf16.msra.mxu0 %v2096_v0  ;;  %v2103_v5 = vld [vmem:[#allocation2 + $0x70] sm:$0xff]  ;;  %v2094_v8 = vld [vmem:[#allocation2 + $0x28] sm:$0xff]  ;;  %vm837_vm2 = vcmask 130048  }
   0xe   :  { %v2112_v2 = vld [vmem:[#allocation2 + $0xb8] sm:$0xff]  ;;  %631 = vmatpush.bf16.msra.mxu1 %v2104_v1  ;;  %v2111_v6 = vld [vmem:[#allocation2 + $0xb0] sm:$0xff]  ;;  %v2102_v9 = vld [vmem:[#allocation2 + $0x68] sm:$0xff] }
   0xf   :  { %v2120_v3 = vld [vmem:[#allocation2 + $0xf8] sm:$0xff]  ;;  %644 = vmatpush.bf16.msra.mxu2 %v2112_v2  ;;  %v2119_v7 = vld [vmem:[#allocation2 + $0xf0] sm:$0xff]  ;;  %v2110_v10 = vld [vmem:[#allocation2 + $0xa8] sm:$0xff] }
  0x10   :  { %657 = vmatpush.bf16.msra.mxu3 %v2120_v3  ;;  %v2118_v11 = vld [vmem:[#allocation2 + $0xe8] sm:$0xff]  ;;  %v2093_v12 = vld [vmem:[#allocation2 + $0x20] sm:$0xff]  ;;  %v2092_v16 = vld [vmem:[#allocation2 + $0x18] sm:$0xff] }
  0x11   :  { %619 = vmatpush.bf16.msra.mxu0 %v2095_v4  ;;  %v2101_v13 = vld [vmem:[#allocation2 + $0x60] sm:$0xff]  ;;  %v2100_v17 = vld [vmem:[#allocation2 + $0x58] sm:$0xff]  ;;  %v2091_v20 = vld [vmem:[#allocation2 + $0x10] sm:$0xff] }
  0x12   :  { %632 = vmatpush.bf16.msra.mxu1 %v2103_v5  ;;  %v2109_v14 = vld [vmem:[#allocation2 + $0xa0] sm:$0xff]  ;;  %v2108_v18 = vld [vmem:[#allocation2 + $0x98] sm:$0xff]  ;;  %v2099_v21 = vld [vmem:[#allocation2 + $0x50] sm:$0xff] }
  0x13   :  { %645 = vmatpush.bf16.msra.mxu2 %v2111_v6  ;;  %v2117_v15 = vld [vmem:[#allocation2 + $0xe0] sm:$0xff]  ;;  %v2116_v19 = vld [vmem:[#allocation2 + $0xd8] sm:$0xff]  ;;  %v2107_v22 = vld [vmem:[#allocation2 + $0x90] sm:$0xff] }
  0x14   :  { %658 = vmatpush.bf16.msra.mxu3 %v2119_v7  ;;  %v2115_v23 = vld [vmem:[#allocation2 + $0xd0] sm:$0xff]  ;;  %v2090_v24 = vld [vmem:[#allocation2 + $0x8] sm:$0xff]  ;;  %v70_v29 = vld [vmem:[%s2531_s0] sm:$0xff] }
  0x15   :  { %620 = vmatpush.bf16.msra.mxu0 %v2094_v8  ;;  %v2098_v25 = vld [vmem:[#allocation2 + $0x48] sm:$0xff]  ;;  %v2089_v30 = vld [vmem:[#allocation2] sm:$0xff]  ;;  %v210_v33 = vunpack.c.l.b16 %v70_v29  ;;  %v211_v37 = vunpack.c.h.b16 %v70_v29  ;;  %v2128_v38 = vld [vmem:[#allocation2 + $0x138] sm:$0xff] }
  0x16   :  { %633 = vmatpush.bf16.msra.mxu1 %v2102_v9  ;;  %v2106_v26 = vld [vmem:[#allocation2 + $0x88] sm:$0xff]  ;;  %v2097_v31 = vld [vmem:[#allocation2 + $0x40] sm:$0xff]  ;;  %v2136_v39 = vld [vmem:[#allocation2 + $0x178] sm:$0xff] }
  0x17   :  { %646 = vmatpush.bf16.msra.mxu2 %v2110_v10  ;;  %v2114_v27 = vld [vmem:[#allocation2 + $0xc8] sm:$0xff]  ;;  %v2105_v34 = vld [vmem:[#allocation2 + $0x80] sm:$0xff]  ;;  %v2144_v40 = vld [vmem:[#allocation2 + $0x1b8] sm:$0xff]  ;;  %v218_v43 = vpack.c.b16 %v210_v33, %v210_v33  ;;  %v219_v45 = vpack.c.b16 %v211_v37, %v211_v37 }
  0x18   :  { %659 = vmatpush.bf16.msra.mxu3 %v2118_v11  ;;  %v71_v28 = vld [vmem:[%s2531_s0 + $0x8] sm:$0xff]  ;;  %v2113_v35 = vld [vmem:[#allocation2 + $0xc0] sm:$0xff]  ;;  %v2152_v41 = vld [vmem:[#allocation2 + $0x1f8] sm:$0xff] }
  0x19   :  { %621 = vmatpush.bf16.msra.mxu0 %v2093_v12  ;;  %v212_v32 = vunpack.c.l.b16 %v71_v28  ;;  %v213_v36 = vunpack.c.h.b16 %v71_v28  ;;  %v2127_v46 = vld [vmem:[#allocation2 + $0x130] sm:$0xff]  ;;  %v2126_v50 = vld [vmem:[#allocation2 + $0x128] sm:$0xff]  ;;  %v2125_v54 = vld [vmem:[#allocation2 + $0x120] sm:$0xff] }
  0x1a   :  { %634 = vmatpush.bf16.msra.mxu1 %v2101_v13  ;;  %v2135_v47 = vld [vmem:[#allocation2 + $0x170] sm:$0xff]  ;;  %v2134_v51 = vld [vmem:[#allocation2 + $0x168] sm:$0xff]  ;;  %v2133_v55 = vld [vmem:[#allocation2 + $0x160] sm:$0xff] }
  0x1b   :  { %647 = vmatpush.bf16.msra.mxu2 %v2109_v14  ;;  %v220_v42 = vpack.c.b16 %v212_v32, %v212_v32  ;;  %v221_v44 = vpack.c.b16 %v213_v36, %v213_v36  ;;  %v2143_v48 = vld [vmem:[#allocation2 + $0x1b0] sm:$0xff]  ;;  %v2142_v52 = vld [vmem:[#allocation2 + $0x1a8] sm:$0xff]  ;;  %v2141_v56 = vld [vmem:[#allocation2 + $0x1a0] sm:$0xff] }
  0x1c   :  { %660 = vmatpush.bf16.msra.mxu3 %v2117_v15  ;;  %v2151_v49 = vld [vmem:[#allocation2 + $0x1f0] sm:$0xff]  ;;  %v2150_v53 = vld [vmem:[#allocation2 + $0x1e8] sm:$0xff]  ;;  %v2149_v57 = vld [vmem:[#allocation2 + $0x1e0] sm:$0xff] }
  0x1d   :  { %622 = vmatpush.bf16.msra.mxu0 %v2092_v16  ;;  %v2124_v58 = vld [vmem:[#allocation2 + $0x118] sm:$0xff]  ;;  %v2123_v62 = vld [vmem:[#allocation2 + $0x110] sm:$0xff]  ;;  %v2122_v2 = vld [vmem:[#allocation2 + $0x108] sm:$0xff] }
  0x1e   :  { %635 = vmatpush.bf16.msra.mxu1 %v2100_v17  ;;  %v2132_v59 = vld [vmem:[#allocation2 + $0x158] sm:$0xff]  ;;  %v2131_v63 = vld [vmem:[#allocation2 + $0x150] sm:$0xff]  ;;  %v2130_v3 = vld [vmem:[#allocation2 + $0x148] sm:$0xff] }
  0x1f   :  { %648 = vmatpush.bf16.msra.mxu2 %v2108_v18  ;;  %v2140_v60 = vld [vmem:[#allocation2 + $0x198] sm:$0xff]  ;;  %v2139_v0 = vld [vmem:[#allocation2 + $0x190] sm:$0xff]  ;;  %v2138_v5 = vld [vmem:[#allocation2 + $0x188] sm:$0xff] }
  0x20   :  { %661 = vmatpush.bf16.msra.mxu3 %v2116_v19  ;;  %v2148_v61 = vld [vmem:[#allocation2 + $0x1d8] sm:$0xff]  ;;  %v2147_v1 = vld [vmem:[#allocation2 + $0x1d0] sm:$0xff]  ;;  %v2146_v6 = vld [vmem:[#allocation2 + $0x1c8] sm:$0xff] }
  0x21   :  { %623 = vmatpush.bf16.msra.mxu0 %v2091_v20  ;;  %v72_v4 = vld [vmem:[%s2531_s0 + $0x10] sm:$0xff]  ;;  %v73_v7 = vld [vmem:[%s2531_s0 + $0x18] sm:$0xff]  ;;  %v2121_v10 = vld [vmem:[#allocation2 + $0x100] sm:$0xff] }
  0x22   :  { %636 = vmatpush.bf16.msra.mxu1 %v2099_v21  ;;  %v214_v8 = vunpack.c.l.b16 %v72_v4  ;;  %v215_v9 = vunpack.c.h.b16 %v72_v4  ;;  %v2129_v11 = vld [vmem:[#allocation2 + $0x140] sm:$0xff]  ;;  %v216_v12 = vunpack.c.l.b16 %v73_v7  ;;  %v217_v13 = vunpack.c.h.b16 %v73_v7  ;;  %v2160_v20 = vld [vmem:[%s2535_s4 + $0x38] sm:$0xff]  ;;  %v2159_v21 = vld [vmem:[%s2535_s4 + $0x30] sm:$0xff] }
  0x23   :  { %649 = vmatpush.bf16.msra.mxu2 %v2107_v22  ;;  %v2137_v14 = vld [vmem:[#allocation2 + $0x180] sm:$0xff]  ;;  %v2158_v22 = vld [vmem:[%s2535_s4 + $0x28] sm:$0xff] }
  0x24   :  { %662 = vmatpush.bf16.msra.mxu3 %v2115_v23  ;;  %v2145_v15 = vld [vmem:[#allocation2 + $0x1c0] sm:$0xff]  ;;  %v222_v16 = vpack.c.b16 %v214_v8, %v214_v8  ;;  %v223_v17 = vpack.c.b16 %v215_v9, %v215_v9  ;;  %v224_v18 = vpack.c.b16 %v216_v12, %v216_v12  ;;  %v225_v19 = vpack.c.b16 %v217_v13, %v217_v13  ;;  %v2154_v28 = vld [vmem:[%s2535_s4 + $0x8] sm:$0xff] }
  0x25   :  { %624 = vmatpush.bf16.msra.mxu0 %v2090_v24  ;;  %v2157_v23 = vld [vmem:[%s2535_s4 + $0x20] sm:$0xff]  ;;  %v2156_v24 = vld [vmem:[%s2535_s4 + $0x18] sm:$0xff]  ;;  %v2059_v9 = vld [vmem:[#allocation4 + $0x1c8] sm:$0xf] }
  0x26   :  { %637 = vmatpush.bf16.msra.mxu1 %v2098_v25  ;;  %v2153_v32 = vld [vmem:[%s2535_s4] sm:$0xff]  ;;  %v2219_v13 = vld [vmem:[#allocation4 + $0x1cc] sm:$0xf] }
  0x27   :  { %650 = vmatpush.bf16.msra.mxu2 %v2106_v26  ;;  %v2155_v26 = vld [vmem:[%s2535_s4 + $0x10] sm:$0xff]  ;;  %v2051_v4 = vld [vmem:[#allocation4 + $0x1c0] sm:$0xf]  ;;  %v2053_v8 = vld [vmem:[#allocation4 + $0x1e0] sm:$0xf0] }
  0x28   :  { %663 = vmatpush.bf16.msra.mxu3 %v2114_v27 }
  0x29   :  { %625 = vmatpush.bf16.msra.mxu0 %v2089_v30 }
  0x2a   :  { %638 = vmatpush.bf16.msra.mxu1 %v2097_v31 }
  0x2b   :  { %651 = vmatpush.bf16.msra.mxu2 %v2105_v34  ;;  %v2234_v34 = vld [vmem:[%s2534_s3] ss:$0 sm:$0xff] }
  0x2c   :  { %664 = vmatpush.bf16.msra.mxu3 %v2113_v35  ;;  %626 = vmatmul.bf16.vlgmr.msra.gmra.mxu0 %v218_v43  ;;  %v813_v35 = vld [vmem:[%s2532_s1] sm:$0xff] }
  0x2d   :  { %670 = vmatpush.bf16.msrb.mxu0 %v2128_v38  ;;  %639 = vmatmul.bf16.vlgmr.msra.gmra.mxu1 %v219_v45 }
  0x2e   :  { %683 = vmatpush.bf16.msrb.mxu1 %v2136_v39  ;;  %652 = vmatmul.bf16.vlgmr.msra.gmra.mxu2 %v220_v42 }
  0x2f   :  { %696 = vmatpush.bf16.msrb.mxu2 %v2144_v40  ;;  %665 = vmatmul.bf16.vlgmr.msra.gmra.mxu3 %v221_v44 }
  0x30   :  { %709 = vmatpush.bf16.msrb.mxu3 %v2152_v41  ;;  %815 = vrot.lane.b32.xlu0 %v813_v35, %s2329_s16  ;;  %v2203_v35 = vld [vmem:[#allocation4 + $0x14c] sm:$0xf] }
  0x31   :  { %671 = vmatpush.bf16.msrb.mxu0 %v2127_v46 }
  0x32   :  { %684 = vmatpush.bf16.msrb.mxu1 %v2135_v47 }
  0x33   :  { %697 = vmatpush.bf16.msrb.mxu2 %v2143_v48 }
  0x34   :  { %710 = vmatpush.bf16.msrb.mxu3 %v2151_v49 }
  0x35   :  { %672 = vmatpush.bf16.msrb.mxu0 %v2126_v50 }
  0x36   :  { %685 = vmatpush.bf16.msrb.mxu1 %v2134_v51 }
  0x37   :  { %698 = vmatpush.bf16.msrb.mxu2 %v2142_v52 }
  0x38   :  { %711 = vmatpush.bf16.msrb.mxu3 %v2150_v53 }
  0x39   :  { %673 = vmatpush.bf16.msrb.mxu0 %v2125_v54 }
  0x3a   :  { %686 = vmatpush.bf16.msrb.mxu1 %v2133_v55 }
  0x3b   :  { %699 = vmatpush.bf16.msrb.mxu2 %v2141_v56  ;;  %v2161_v56 = vld [vmem:[%s2537_s6] sm:$0xff] }
  0x3c   :  { %712 = vmatpush.bf16.msrb.mxu3 %v2149_v57  ;;  %v2235_v57 = vld [vmem:[%s2536_s5] ss:$0 sm:$0xff]  ;;  %s2330_s5 = smov 112  }
  0x3d   :  { %674 = vmatpush.bf16.msrb.mxu0 %v2124_v58 }
  0x3e   :  { %687 = vmatpush.bf16.msrb.mxu1 %v2132_v59 }
  0x3f   :  { %700 = vmatpush.bf16.msrb.mxu2 %v2140_v60  ;;  %v807_v60 = vlaneseq }
  0x40   :  { %713 = vmatpush.bf16.msrb.mxu3 %v2148_v61 }
  0x41   :  { %675 = vmatpush.bf16.msrb.mxu0 %v2123_v62  ;;  %v808_v62 = vand.u32 127, %v807_v60  ;;  %v1933_v60 = vld [vmem:[#allocation4 + $0xe8] sm:$0xf0] }
  0x42   :  { %688 = vmatpush.bf16.msrb.mxu1 %v2131_v63 }
  0x43   :  { %701 = vmatpush.bf16.msrb.mxu2 %v2139_v0  ;;  %vm809_vm0 = vcmp.lt.s32.totalorder %v808_v62, 16 }
  0x44   :  { %714 = vmatpush.bf16.msrb.mxu3 %v2147_v1 }
  0x45   :  { %676 = vmatpush.bf16.msrb.mxu0 %v2122_v2 }
  0x46   :  { %689 = vmatpush.bf16.msrb.mxu1 %v2130_v3 }
  0x47   :  { %702 = vmatpush.bf16.msrb.mxu2 %v2138_v5  ;;  %v2222_v5 = vld [vmem:[#allocation4 + $0x1dc] sm:$0xf0] }
  0x48   :  { %715 = vmatpush.bf16.msrb.mxu3 %v2146_v6  ;;  %v2218_v6 = vld [vmem:[#allocation4 + $0x1c4] sm:$0xf]  ;;  %v2052_v7 = vor.u32 %v2222_v5, %v2051_v4  ;;  %v1899_v5 = vld [vmem:[#allocation4 + $0x88] sm:$0xf] }
  0x49   :  { %677 = vmatpush.bf16.msrb.mxu0 %v2121_v10  ;;  %v2223_v10 = vld [vmem:[#allocation4 + $0x1e4] sm:$0xf0]  ;;  %v1893_v4 = vld [vmem:[#allocation4 + $0xa0] sm:$0xf0] }
  0x4a   :  { %690 = vmatpush.bf16.msrb.mxu1 %v2129_v11  ;;  %v2056_v11 = vor.u32 %v2218_v6, %v2053_v8  ;;  %v2060_v12 = vor.u32 %v2223_v10, %v2059_v9  ;;  %v2183_v6 = vld [vmem:[#allocation4 + $0xa4] sm:$0xf0]  ;;  %v1901_v8 = vld [vmem:[#allocation4 + $0xa8] sm:$0xf0] }
  0x4b   :  { %703 = vmatpush.bf16.msrb.mxu2 %v2137_v14  ;;  %v2061_v14 = vld [vmem:[#allocation4 + $0x1e8] sm:$0xf0] }
  0x4c   :  { %716 = vmatpush.bf16.msrb.mxu3 %v2145_v15  ;;  %678 = vmatmul.bf16.vlgmr.msrb.gmra.mxu0 %v222_v16  ;;  %v2019_v15 = vld [vmem:[#allocation4 + $0x180] sm:$0xf]  ;;  %v2064_v16 = vor.u32 %v2219_v13, %v2061_v14  ;;  %v2170_v14 = vld [vmem:[#allocation4 + $0x44] sm:$0xf] }
  0x4d   :  { %691 = vmatmul.bf16.vlgmr.msrb.gmra.mxu1 %v223_v17  ;;  %792 = vmatpush.bf16.msra.mxu0 %v2160_v20  ;;  %v2214_v17 = vld [vmem:[#allocation4 + $0x19c] sm:$0xf0] }
  0x4e   :  { %704 = vmatmul.bf16.vlgmr.msrb.gmra.mxu2 %v224_v18  ;;  %848 = vmatpush.bf16.msra.mxu1 %v2161_v56  ;;  %v2210_v18 = vld [vmem:[#allocation4 + $0x184] sm:$0xf]  ;;  %v2020_v20 = vor.u32 %v2214_v17, %v2019_v15  ;;  %v1931_v56 = vld [vmem:[#allocation4 + $0xc8] sm:$0xf]  ;;  %v2174_v13 = vld [vmem:[#allocation4 + $0x5c] sm:$0xf0] }
  0x4f   :  { %717 = vmatmul.bf16.vlgmr.msrb.gmra.mxu3 %v225_v19  ;;  %1258 = vmatpush.bf16.msra.mxu2 %v2052_v7  ;;  %v2021_v19 = vld [vmem:[#allocation4 + $0x1a0] sm:$0xf0]  ;;  %v2179_v7 = vld [vmem:[#allocation4 + $0x8c] sm:$0xf]  ;;  %v1867_v17 = vld [vmem:[#allocation4 + $0x48] sm:$0xf] }
  0x50   :  { %1271 = vmatpush.bf16.msra.mxu3 %v2056_v11  ;;  %v1900_v11 = vor.u32 %v2183_v6, %v1899_v5  ;;  %v1904_v15 = vor.u32 %v2179_v7, %v1901_v8  ;;  %v2011_v5 = vld [vmem:[#allocation4 + $0x158] sm:$0xf] }
  0x51   :  { %793 = vmatpush.bf16.msra.mxu0 %v2159_v21  ;;  %v2024_v21 = vor.u32 %v2210_v18, %v2021_v19  ;;  %v2175_v18 = vld [vmem:[#allocation4 + $0x64] sm:$0xf0]  ;;  %v2171_v19 = vld [vmem:[#allocation4 + $0x4c] sm:$0xf]  ;;  %v2209_v6 = vld [vmem:[#allocation4 + $0x174] sm:$0xf0] }
  0x52   :  { %1284 = vmatpush.bf16.msrb.mxu1 %v2060_v12  ;;  %v1859_v12 = vld [vmem:[#allocation4 + $0x40] sm:$0xf]  ;;  %v2012_v8 = vor.u32 %v2209_v6, %v2011_v5 }
  0x53   :  { %1259 = vmatpush.bf16.msra.mxu2 %v2020_v20  ;;  %v1869_v20 = vld [vmem:[#allocation4 + $0x68] sm:$0xf0] }
  0x54   :  { %1272 = vmatpush.bf16.msra.mxu3 %v2024_v21  ;;  %v1860_v21 = vor.u32 %v2174_v13, %v1859_v12  ;;  %v1971_v12 = vld [vmem:[#allocation4 + $0x110] sm:$0xf] }
  0x55   :  { %794 = vmatpush.bf16.msra.mxu0 %v2158_v22  ;;  %v2027_v22 = vld [vmem:[#allocation4 + $0x188] sm:$0xf]  ;;  %v2200_v13 = vld [vmem:[#allocation4 + $0x12c] sm:$0xf0] }
  0x59   :  { %795 = vmatpush.bf16.msra.mxu0 %v2157_v23  ;;  %v2215_v23 = vld [vmem:[#allocation4 + $0x1a4] sm:$0xf0] }
  0x5d   :  { %796 = vmatpush.bf16.msra.mxu0 %v2156_v24  ;;  %v2211_v24 = vld [vmem:[#allocation4 + $0x18c] sm:$0xf] }
  0x61   :  { %797 = vmatpush.bf16.msra.mxu0 %v2155_v26  ;;  %v2029_v26 = vld [vmem:[#allocation4 + $0x1a8] sm:$0xf0] }
  0x65   :  { %798 = vmatpush.bf16.msra.mxu0 %v2154_v28  ;;  %v2206_v28 = vld [vmem:[#allocation4 + $0x15c] sm:$0xf0] }
  0x69   :  { %799 = vmatpush.bf16.msra.mxu0 %v2153_v32  ;;  %v1995_v32 = vld [vmem:[#allocation4 + $0x148] sm:$0xf] }
  0x6d   :  { %1297 = vmatpush.bf16.msrb.mxu0 %v2064_v16  ;;  %v1861_v16 = vld [vmem:[#allocation4 + $0x60] sm:$0xf0] }
  0xa2   :  { %v816_v0 = vpop.permute.xlu0 %815 }
  0xa9   :  { %v627_v25 = vpop.f32.mrf.mxu0 }
  0xaa   :  { %v640_v27 = vpop.f32.mrf.mxu1  ;;  %v628_v38 = vadd.f32 %v2234_v34, %v627_v25  ;;  %v2028_v25 = vor.u32 %v2215_v23, %v2027_v22  ;;  %v2207_v34 = vld [vmem:[#allocation4 + $0x164] sm:$0xf0]  ;;  %v1827_v22 = vld [vmem:[#allocation4] sm:$0xf]  ;;  %v1864_v23 = vor.u32 %v2170_v14, %v1861_v16  ;;  %v2196_v14 = vld [vmem:[#allocation4 + $0x114] sm:$0xf] }
  0xab   :  { %v1973_v16 = vld [vmem:[#allocation4 + $0x130] sm:$0xf0] }
  0xac   :  { %v641_v39 = vadd.f32 %v640_v27, %v628_v38  ;;  %v1987_v27 = vld [vmem:[#allocation4 + $0x140] sm:$0xf]  ;;  %1285 = vmatpush.bf16.msrb.mxu1 %v2028_v25  ;;  %v1996_v38 = vor.u32 %v2207_v34, %v1995_v32  ;;  %v1837_v32 = vld [vmem:[#allocation4 + $0x28] sm:$0xf0]  ;;  %v2224_v34 = vld [vmem:[#allocation4 + $0x1ec] sm:$0xf0] }
  0xad   :  { %v2166_v25 = vld [vmem:[#allocation4 + $0x1c] sm:$0xf0] }
  0xb0   :  { %1286 = vmatpush.bf16.msrb.mxu1 %v1996_v38  ;;  %v2069_v38 = vld [vmem:[#allocation4 + $0x1f0] sm:$0xf0] }
  0xb1   :  { %v653_v29 = vpop.f32.mrf.mxu2  ;;  %v629_v31 = vpop.f32.mrf.mxu0 }
  0xb2   :  { %v666_v30 = vpop.f32.mrf.mxu3  ;;  %v642_v33 = vpop.f32.mrf.mxu1  ;;  %v654_v40 = vadd.f32 %v653_v29, %v641_v39  ;;  %v2032_v29 = vor.u32 %v2211_v24, %v2029_v26  ;;  %v1989_v31 = vld [vmem:[#allocation4 + $0x160] sm:$0xf0]  ;;  %v1955_v39 = vld [vmem:[#allocation4 + $0x100] sm:$0xf]  ;;  %v1868_v24 = vor.u32 %v2175_v18, %v1867_v17  ;;  %v1979_v17 = vld [vmem:[#allocation4 + $0x118] sm:$0xf] }
  0xb3   :  { %v1988_v33 = vor.u32 %v2206_v28, %v1987_v27  ;;  %v2162_v26 = vld [vmem:[#allocation4 + $0x4] sm:$0xf]  ;;  %v1872_v28 = vor.u32 %v2171_v19, %v1869_v20  ;;  %v2201_v18 = vld [vmem:[#allocation4 + $0x134] sm:$0xf0]  ;;  %v1976_v19 = vor.u32 %v2196_v14, %v1973_v16 }
  0xb4   :  { %v667_v41 = vadd.f32 %v666_v30, %v654_v40  ;;  %v2202_v30 = vld [vmem:[#allocation4 + $0x144] sm:$0xf]  ;;  %v2198_v40 = vld [vmem:[#allocation4 + $0x11c] sm:$0xf0]  ;;  %1298 = vmatpush.bf16.msrb.mxu0 %v2032_v29  ;;  %v1835_v29 = vld [vmem:[#allocation4 + $0x8] sm:$0xf]  ;;  %v1980_v20 = vor.u32 %v2201_v18, %v1979_v17 }
  0xb5   :  { %1260 = vmatpush.bf16.msra.mxu2 %v1988_v33  ;;  %v1829_v27 = vld [vmem:[#allocation4 + $0x20] sm:$0xf0]  ;;  %v2067_v33 = vld [vmem:[#allocation4 + $0x1d0] sm:$0xf] }
  0xb6   :  { %v2459_v14 = vld [vmem:[%s2540_s9] sm:$0xff] }
  0xb7   :  { %v925_v16 = vperm.slane %v2459_v14, 3 }
  0xb9   :  { %v655_v36 = vpop.f32.mrf.mxu2 }
  0xba   :  { %v668_v37 = vpop.f32.mrf.mxu3  ;;  %v1997_v36 = vld [vmem:[#allocation4 + $0x168] sm:$0xf0] }
  0xbb   :  { %v1992_v37 = vor.u32 %v2202_v30, %v1989_v31  ;;  %v2167_v30 = vld [vmem:[#allocation4 + $0x24] sm:$0xf0]  ;;  %v2163_v31 = vld [vmem:[#allocation4 + $0xc] sm:$0xf] }
  0xbd   :  { %1273 = vmatpush.bf16.msra.mxu3 %v1992_v37  ;;  %v2220_v37 = vld [vmem:[#allocation4 + $0x1d4] sm:$0xf] }
  0xc9   :  { %v679_v42 = vpop.f32.mrf.mxu0 }
  0xca   :  { %v692_v43 = vpop.f32.mrf.mxu1  ;;  %v680_v44 = vadd.f32 %v679_v42, %v667_v41  ;;  %v2194_v41 = vld [vmem:[#allocation4 + $0x104] sm:$0xf]  ;;  %v2000_v42 = vor.u32 %v2203_v35, %v1997_v36  ;;  %v1828_v36 = vor.u32 %v2166_v25, %v1827_v22  ;;  %v1981_v22 = vld [vmem:[#allocation4 + $0x138] sm:$0xf0]  ;;  %v2192_v25 = vld [vmem:[#allocation4 + $0xec] sm:$0xf0] }
  0xcc   :  { %v693_v45 = vadd.f32 %v692_v43, %v680_v44  ;;  %v1957_v43 = vld [vmem:[#allocation4 + $0x120] sm:$0xf0]  ;;  %v1963_v44 = vld [vmem:[#allocation4 + $0x108] sm:$0xf]  ;;  %1299 = vmatpush.bf16.msrb.mxu0 %v2000_v42  ;;  %v2225_v42 = vld [vmem:[#allocation4 + $0x1f4] sm:$0xf0] }
  0xd1   :  { %v705_v46 = vpop.f32.mrf.mxu2  ;;  %v681_v49 = vpop.f32.mrf.mxu0 }
  0xd2   :  { %v718_v47 = vpop.f32.mrf.mxu3  ;;  %v706_v48 = vadd.f32 %v705_v46, %v693_v45  ;;  %v694_v50 = vpop.f32.mrf.mxu1  ;;  %v2199_v45 = vld [vmem:[#allocation4 + $0x124] sm:$0xf0]  ;;  %v2195_v46 = vld [vmem:[#allocation4 + $0x10c] sm:$0xf]  ;;  %v1960_v49 = vor.u32 %v2194_v41, %v1957_v43  ;;  %v1832_v41 = vor.u32 %v2162_v26, %v1829_v27  ;;  %v2221_v43 = vld [vmem:[#allocation4 + $0x1dc] sm:$0xf] }
  0xd3   :  { %v1964_v50 = vor.u32 %v2199_v45, %v1963_v44  ;;  %v2077_v44 = vld [vmem:[#allocation4 + $0x1f8] sm:$0xf0]  ;;  %v1836_v45 = vor.u32 %v2167_v30, %v1835_v29  ;;  %v2188_v26 = vld [vmem:[#allocation4 + $0xd4] sm:$0xf]  ;;  %v1947_v29 = vld [vmem:[#allocation4 + $0xd8] sm:$0xf] }
  0xd4   :  { %v719_v51 = vadd.f32 %v718_v47, %v706_v48  ;;  %v1965_v47 = vld [vmem:[#allocation4 + $0x128] sm:$0xf0]  ;;  %v1956_v48 = vor.u32 %v2198_v40, %v1955_v39  ;;  %1274 = vmatpush.bf16.msra.mxu3 %v1960_v49  ;;  %v2075_v39 = vld [vmem:[#allocation4 + $0x1d8] sm:$0xf]  ;;  %v2072_v49 = vor.u32 %v2220_v37, %v2069_v38  ;;  %v2184_v37 = vld [vmem:[#allocation4 + $0xac] sm:$0xf0] }
  0xd5   :  { %1287 = vmatpush.bf16.msrb.mxu1 %v1964_v50  ;;  %v2035_v50 = vld [vmem:[#allocation4 + $0x190] sm:$0xf]  ;;  %v2193_v30 = vld [vmem:[#allocation4 + $0xf4] sm:$0xf0]  ;;  %v2180_v38 = vld [vmem:[#allocation4 + $0x94] sm:$0xf] }
  0xd6   :  { %v722_v52 = vmax.f32 %v719_v51, 0.0  ;;  %v1923_v51 = vld [vmem:[#allocation4 + $0xc0] sm:$0xf]  ;;  %1261 = vmatpush.bf16.msra.mxu2 %v1956_v48  ;;  %v2068_v48 = vor.u32 %v2224_v34, %v2067_v33  ;;  %v2189_v33 = vld [vmem:[#allocation4 + $0xdc] sm:$0xf] }
  0xd7   :  { %v1949_v34 = vld [vmem:[#allocation4 + $0xf8] sm:$0xf0] }
  0xd8   :  { %v723_v53 = vpack.c.bf16 %v722_v52, %v722_v52  ;;  %v2190_v52 = vld [vmem:[#allocation4 + $0xdc] sm:$0xf0] }
  0xd9   :  { %v707_v54 = vpop.f32.mrf.mxu2 }
  0xda   :  { %v720_v55 = vpop.f32.mrf.mxu3  ;;  %800 = vmatmul.bf16.vlgmr.msra.gmra.mxu0 %v723_v53  ;;  %v2186_v53 = vld [vmem:[#allocation4 + $0xc4] sm:$0xf]  ;;  %v1968_v54 = vor.u32 %v2195_v46, %v1965_v47  ;;  %v1840_v46 = vor.u32 %v2163_v31, %v1837_v32  ;;  %v1948_v32 = vor.u32 %v2193_v30, %v1947_v29 }
  0xdb   :  { %v1925_v55 = vld [vmem:[#allocation4 + $0xe0] sm:$0xf0] }
  0xdc   :  { %v1928_v62 = vor.u32 %v2186_v53, %v1925_v55  ;;  %1300 = vmatpush.bf16.msrb.mxu0 %v1968_v54  ;;  %v2080_v53 = vor.u32 %v2221_v43, %v2077_v44  ;;  %v2212_v54 = vld [vmem:[#allocation4 + $0x194] sm:$0xf]  ;;  %v2043_v55 = vld [vmem:[#allocation4 + $0x198] sm:$0xf]  ;;  %v2181_v44 = vld [vmem:[#allocation4 + $0x9c] sm:$0xf] }
  0xdd   :  { %v2185_v43 = vld [vmem:[#allocation4 + $0xb4] sm:$0xf0] }
  0xde   :  { %1275 = vmatpush.bf16.msra.mxu3 %v1928_v62 }
 0x157   :  { %v801_v58 = vpop.f32.mrf.mxu0 }
 0x158   :  { %v2445_v59 = vadd.f32 %v2235_v57, %v801_v58  ;;  %v2191_v57 = vld [vmem:[#allocation4 + $0xe4] sm:$0xf0]  ;;  %v2187_v58 = vld [vmem:[#allocation4 + $0xcc] sm:$0xf] }
 0x15a   :  { %v805_v61 = vmul.f32 1.442695, %v2445_v59 }
 0x15c   :  { %2237 = vpow2.f32 %v805_v61  ;;  %v1924_v61 = vor.u32 %v2190_v52, %v1923_v51  ;;  %v2216_v51 = vld [vmem:[#allocation4 + $0x1ac] sm:$0xf0]  ;;  %v2076_v52 = vor.u32 %v2225_v42, %v2075_v39  ;;  %v1909_v39 = vld [vmem:[#allocation4 + $0xb0] sm:$0xf0]  ;;  %v1915_v42 = vld [vmem:[#allocation4 + $0x98] sm:$0xf] }
 0x15e   :  { %1262 = vmatpush.bf16.msra.mxu2 %v1924_v61 }
 0x15f   :  { %v803_v63 = vpop.f32.mrf.mxu0 }
 0x160   :  { %v1932_v63 = vor.u32 %v2191_v57, %v1931_v56  ;;  %v2217_v56 = vld [vmem:[#allocation4 + $0x1b4] sm:$0xf0]  ;;  %v2213_v57 = vld [vmem:[#allocation4 + $0x19c] sm:$0xf] }
 0x161   :  { %v2044_v62 = vor.u32 %v2217_v56, %v2043_v55  ;;  %v1885_v55 = vld [vmem:[#allocation4 + $0x78] sm:$0xf0] }
 0x162   :  { %v2238_v1 = vpop.eup %2237  ;;  %1288 = vmatpush.bf16.msrb.mxu1 %v1932_v63 }
 0x163   :  { %v810_v2 = vsel %vm809_vm0, %v2445_v59, %v2238_v1  ;;  %v818_v3 = vmul.f32 %v2238_v1, %v816_v0  ;;  %v1891_v0 = vld [vmem:[#allocation4 + $0x80] sm:$0xf] }
 0x164   :  { %812 = vst.msk [vmem:[%s2541_s10] sm:$0xff] %vm811_vm1, %v810_v2  ;;  %v2182_v1 = vld [vmem:[#allocation4 + $0x9c] sm:$0xf0]  ;;  %v2178_v2 = vld [vmem:[#allocation4 + $0x84] sm:$0xf] }
 0x165   :  { %820 = vrot.lane.b32.xlu0 %v818_v3, %s2330_s5  ;;  %v1936_v3 = vor.u32 %v2187_v58, %v1933_v60  ;;  %v1892_v9 = vor.u32 %v2182_v1, %v1891_v0  ;;  %v1896_v10 = vor.u32 %v2178_v2, %v1893_v4  ;;  %v2045_v58 = vld [vmem:[#allocation4 + $0x1b8] sm:$0xf0]  ;;  %v2036_v60 = vor.u32 %v2216_v51, %v2035_v50  ;;  %v2003_v0 = vld [vmem:[#allocation4 + $0x150] sm:$0xf]  ;;  %v2204_v2 = vld [vmem:[#allocation4 + $0x154] sm:$0xf] }
 0x166   :  { %1289 = vmatpush.bf16.msrb.mxu1 %v1900_v11  ;;  %v2048_v63 = vor.u32 %v2213_v57, %v2045_v58  ;;  %v2208_v1 = vld [vmem:[#allocation4 + $0x16c] sm:$0xf0]  ;;  %v2005_v4 = vld [vmem:[#allocation4 + $0x170] sm:$0xf0] }
 0x167   :  { %1301 = vmatpush.bf16.msrb.mxu0 %v1936_v3  ;;  %1263 = vmatpush.bf16.msra.mxu2 %v1892_v9  ;;  %v2004_v3 = vor.u32 %v2208_v1, %v2003_v0  ;;  %v2008_v7 = vor.u32 %v2204_v2, %v2005_v4  ;;  %v2205_v9 = vld [vmem:[#allocation4 + $0x15c] sm:$0xf]  ;;  %v2172_v50 = vld [vmem:[#allocation4 + $0x54] sm:$0xf]  ;;  %v1843_v58 = vld [vmem:[#allocation4 + $0x10] sm:$0xf] }
 0x168   :  { %1276 = vmatpush.bf16.msra.mxu3 %v1896_v10  ;;  %v2013_v10 = vld [vmem:[#allocation4 + $0x178] sm:$0xf0]  ;;  %v1877_v51 = vld [vmem:[#allocation4 + $0x70] sm:$0xf0]  ;;  %v1851_v0 = vld [vmem:[#allocation4 + $0x18] sm:$0xf] }
 0x169   :  { %v2016_v11 = vor.u32 %v2205_v9, %v2013_v10  ;;  %v1880_v56 = vor.u32 %v2172_v50, %v1877_v51  ;;  %v2169_v1 = vld [vmem:[#allocation4 + $0x34] sm:$0xf0]  ;;  %v2165_v2 = vld [vmem:[#allocation4 + $0x1c] sm:$0xf]  ;;  %v926_v51 = vperm.slane %v2459_v14, 4 }
 0x16a   :  { %1290 = vmatpush.bf16.msrb.mxu1 %v1868_v24  ;;  %v1939_v24 = vld [vmem:[#allocation4 + $0xd0] sm:$0xf]  ;;  %v1852_v6 = vor.u32 %v2169_v1, %v1851_v0 }
 0x16b   :  { %1302 = vmatpush.bf16.msrb.mxu0 %v1904_v15  ;;  %1264 = vmatpush.bf16.msra.mxu2 %v1860_v21  ;;  %v1972_v15 = vor.u32 %v2200_v13, %v1971_v12  ;;  %v2197_v21 = vld [vmem:[#allocation4 + $0x11c] sm:$0xf]  ;;  %v1940_v27 = vor.u32 %v2192_v25, %v1939_v24 }
 0x16c   :  { %1277 = vmatpush.bf16.msra.mxu3 %v1864_v23  ;;  %v1984_v23 = vor.u32 %v2197_v21, %v1981_v22  ;;  %v922_v21 = vperm.slane %v2459_v14, 0  ;;  %v923_v22 = vperm.slane %v2459_v14, 1 }
 0x16e   :  { %1291 = vmatpush.bf16.msrb.mxu1 %v1836_v45  ;;  %v1916_v45 = vor.u32 %v2185_v43, %v1915_v42 }
 0x16f   :  { %1303 = vmatpush.bf16.msrb.mxu0 %v1872_v28  ;;  %1265 = vmatpush.bf16.msra.mxu2 %v1828_v36  ;;  %v1941_v28 = vld [vmem:[#allocation4 + $0xf0] sm:$0xf0]  ;;  %v1952_v36 = vor.u32 %v2189_v33, %v1949_v34 }
 0x170   :  { %1278 = vmatpush.bf16.msra.mxu3 %v1832_v41  ;;  %v1944_v31 = vor.u32 %v2188_v26, %v1941_v28  ;;  %v1912_v41 = vor.u32 %v2180_v38, %v1909_v39  ;;  %v928_v39 = vperm.slane %v2459_v14, 6 }
 0x173   :  { %1304 = vmatpush.bf16.msrb.mxu0 %v1840_v46  ;;  %1310 = vmatpush.bf16.msrb.mxu2 %v2068_v48  ;;  %v1917_v46 = vld [vmem:[#allocation4 + $0xb8] sm:$0xf0]  ;;  %v2176_v48 = vld [vmem:[#allocation4 + $0x6c] sm:$0xf0] }
 0x174   :  { %1323 = vmatpush.bf16.msrb.mxu3 %v2072_v49  ;;  %v1920_v49 = vor.u32 %v2181_v44, %v1917_v46 }
 0x177   :  { %1349 = vmatpush.bf16.msra.mxu0 %v2080_v53  ;;  %1311 = vmatpush.bf16.msrb.mxu2 %v2036_v60  ;;  %v2168_v60 = vld [vmem:[#allocation4 + $0x2c] sm:$0xf0] }
 0x178   :  { %v1844_v4 = vor.u32 %v2168_v60, %v1843_v58 }
 0x17b   :  { %1350 = vmatpush.bf16.msra.mxu0 %v2048_v63  ;;  %1312 = vmatpush.bf16.msrb.mxu2 %v2004_v3  ;;  %v1845_v63 = vld [vmem:[#allocation4 + $0x30] sm:$0xf0]  ;;  %v1853_v3 = vld [vmem:[#allocation4 + $0x38] sm:$0xf0] }
 0x17f   :  { %1351 = vmatpush.bf16.msra.mxu0 %v2016_v11  ;;  %1313 = vmatpush.bf16.msrb.mxu2 %v1972_v15  ;;  %v924_v15 = vperm.slane %v2459_v14, 2 }
 0x183   :  { %1352 = vmatpush.bf16.msra.mxu0 %v1984_v23  ;;  %1314 = vmatpush.bf16.msrb.mxu2 %v1940_v27 }
 0x187   :  { %1353 = vmatpush.bf16.msra.mxu0 %v1952_v36 }
 0x18b   :  { %1354 = vmatpush.bf16.msra.mxu0 %v1920_v49 }
 0x1d7   :  { %v821_v35 = vpop.permute.xlu0 %820 }
 0x1d8   :  { %v823_v40 = vadd.f32 %v821_v35, %v2445_v59  ;;  %v2037_v59 = vld [vmem:[#allocation4 + $0x1b0] sm:$0xf0]  ;;  %v1907_v35 = vld [vmem:[#allocation4 + $0x90] sm:$0xf] }
 0x1d9   :  { %v2040_v61 = vor.u32 %v2212_v54, %v2037_v59  ;;  %v2177_v54 = vld [vmem:[#allocation4 + $0x74] sm:$0xf0]  ;;  %v2173_v59 = vld [vmem:[#allocation4 + $0x5c] sm:$0xf] }
 0x1da   :  { %v824_v47 = vpack.c.bf16 %v823_v40, %v823_v40  ;;  %v1908_v40 = vor.u32 %v2184_v37, %v1907_v35 }
 0x1db   :  { %1324 = vmatpush.bf16.msrb.mxu3 %v2040_v61  ;;  %v2164_v61 = vld [vmem:[#allocation4 + $0x14] sm:$0xf] }
 0x1dc   :  { %1824 = vmatmul.msk.bf16.vlgmr.msra.gmra.mxu1 %vm837_vm2, %v824_v47  ;;  %v1875_v47 = vld [vmem:[#allocation4 + $0x50] sm:$0xf]  ;;  %1315 = vmatpush.bf16.msrb.mxu2 %v1908_v40  ;;  %v1848_v5 = vor.u32 %v2164_v61, %v1845_v63  ;;  %v929_v40 = vperm.slane %v2459_v14, 7 }
 0x1dd   :  { %1336 = vmatpush.bf16.msra.mxu1 %v2076_v52  ;;  %v1883_v52 = vld [vmem:[#allocation4 + $0x58] sm:$0xf]  ;;  %v1876_v53 = vor.u32 %v2176_v48, %v1875_v47 }
 0x1de   :  { %v1884_v57 = vor.u32 %v2177_v54, %v1883_v52 }
 0x1df   :  { %1325 = vmatpush.bf16.msrb.mxu3 %v2008_v7  ;;  %v1856_v7 = vor.u32 %v2165_v2, %v1853_v3 }
 0x1e0   :  { %1316 = vmatpush.bf16.msrb.mxu2 %v1876_v53 }
 0x1e1   :  { %1337 = vmatpush.bf16.msra.mxu1 %v2044_v62  ;;  %v1888_v62 = vor.u32 %v2173_v59, %v1885_v55  ;;  %v927_v59 = vperm.slane %v2459_v14, 5 }
 0x1e3   :  { %1326 = vmatpush.bf16.msrb.mxu3 %v1976_v19  ;;  %1355 = vmatpush.bf16.msra.mxu0 %v1888_v62 }
 0x1e4   :  { %1317 = vmatpush.bf16.msrb.mxu2 %v1844_v4 }
 0x1e5   :  { %1338 = vmatpush.bf16.msra.mxu1 %v2012_v8  ;;  %v2236_v8 = vld [vmem:[%s2538_s7] ss:$0 sm:$0xff] }
 0x1e7   :  { %1327 = vmatpush.bf16.msrb.mxu3 %v1944_v31  ;;  %1356 = vmatpush.bf16.msra.mxu0 %v1856_v7 }
 0x1e9   :  { %1339 = vmatpush.bf16.msra.mxu1 %v1980_v20 }
 0x1eb   :  { %1328 = vmatpush.bf16.msrb.mxu3 %v1912_v41 }
 0x1ed   :  { %1340 = vmatpush.bf16.msra.mxu1 %v1948_v32 }
 0x1ef   :  { %1329 = vmatpush.bf16.msrb.mxu3 %v1880_v56 }
 0x1f1   :  { %1341 = vmatpush.bf16.msra.mxu1 %v1916_v45 }
 0x1f3   :  { %1330 = vmatpush.bf16.msrb.mxu3 %v1848_v5 }
 0x1f5   :  { %1342 = vmatpush.bf16.msra.mxu1 %v1884_v57 }
 0x1f9   :  { %1343 = vmatpush.bf16.msra.mxu1 %v1852_v6 }
 0x259   :  { %v850_v9 = vpop.f32.mrf.mxu1 }
 0x25a   :  { %v851_v10 = vadd.f32 %v2236_v8, %v850_v9 }
 0x25c   :  { %v854_v11 = vmax.f32 %v851_v10, 0.0 }
 0x25e   :  { %v855_v12 = vpack.c.bf16 %v854_v11, %v854_v11 }
 0x260   :  { %1266 = vmatmul.bf16.vlgmr.msra.gmra.mxu2 %v855_v12  ;;  %1279 = vmatmul.bf16.vlgmr.msra.gmra.mxu3 %v855_v12 }
 0x261   :  { %1292 = vmatmul.bf16.vlgmr.msrb.gmra.mxu1 %v855_v12  ;;  %1305 = vmatmul.bf16.vlgmr.msrb.gmra.mxu0 %v855_v12  ;;  %v852_v13 = vpop.f32.mrf.mxu1 }
 0x270   :  { %1318 = vmatmul.bf16.vlgmr.msrb.gmra.mxu2 %v855_v12  ;;  %1331 = vmatmul.bf16.vlgmr.msrb.gmra.mxu3 %v855_v12 }
 0x271   :  { %1344 = vmatmul.bf16.vlgmr.msra.gmra.mxu1 %v855_v12  ;;  %1357 = vmatmul.bf16.vlgmr.msra.gmra.mxu0 %v855_v12 }
 0x2de   :  { %v1293_v17 = vpop.f32.mrf.mxu1  ;;  %v1306_v18 = vpop.f32.mrf.mxu0 }
 0x2df   :  { %v1294_v19 = vadd.f32 %v1293_v17, %v924_v15  ;;  %v1307_v20 = vadd.f32 %v1306_v18, %v925_v16 }
 0x2e1   :  { %v2083_v23 = vmul.f32 -1.442695, %v1294_v19  ;;  %v2084_v24 = vmul.f32 -1.442695, %v1307_v20 }
 0x2e3   :  { %2239 = vpow2.f32 %v2083_v23  ;;  %v1267_v25 = vpop.f32.mrf.mxu2  ;;  %v1280_v26 = vpop.f32.mrf.mxu3 }
 0x2e4   :  { %2241 = vpow2.f32 %v2084_v24  ;;  %v1268_v27 = vadd.f32 %v1267_v25, %v922_v21  ;;  %v1281_v28 = vadd.f32 %v1280_v26, %v923_v22 }
 0x2e6   :  { %v2081_v29 = vmul.f32 -1.442695, %v1268_v27  ;;  %v2082_v30 = vmul.f32 -1.442695, %v1281_v28  ;;  %v1295_v31 = vpop.f32.mrf.mxu1  ;;  %v1308_v32 = vpop.f32.mrf.mxu0 }
 0x2e8   :  { %2243 = vpow2.f32 %v2081_v29 }
 0x2e9   :  { %v2240_v33 = vpop.eup %2239  ;;  %2245 = vpow2.f32 %v2082_v30 }
 0x2ea   :  { %v2242_v34 = vpop.eup %2241  ;;  %v1388_v35 = vadd.f32 1.0, %v2240_v33 }
 0x2eb   :  { %v2465_v36 = vadd.f32 1.0, %v2242_v34  ;;  %v1269_v37 = vpop.f32.mrf.mxu2  ;;  %v1282_v38 = vpop.f32.mrf.mxu3 }
 0x2ec   :  { %2247 = vrcp.f32 %v1388_v35  ;;  %v1433_v46 = vand.u32 2147483647, %v1388_v35  ;;  %v1435_v47 = vand.u32 2147483648, %v1388_v35  ;;  %vm1429_vm3 = vweird.f32 %v1388_v35 }
 0x2ed   :  { %2249 = vrcp.f32 %v2465_v36  ;;  %v1448_v53 = vand.u32 2147483647, %v2465_v36  ;;  %v1450_v54 = vand.u32 2147483648, %v2465_v36  ;;  %vm1444_vm5 = vweird.f32 %v2465_v36 }
 0x2ee   :  { %v2244_v41 = vpop.eup %2243  ;;  %v1345_v42 = vpop.f32.mrf.mxu1  ;;  %vm2480_vm4 = vcmp.eq.f32.partialorder %v1433_v46, 8.507059e+37  ;;  %v1436_v61 = vor.u32 1.1754944e-38, %v1435_v47 }
 0x2ef   :  { %v1358_v43 = vpop.f32.mrf.mxu0  ;;  %v2246_v44 = vpop.eup %2245  ;;  %v2470_v45 = vadd.f32 1.0, %v2244_v41  ;;  %v1346_v49 = vadd.f32 %v1345_v42, %v928_v39  ;;  %vm2486_vm6 = vcmp.eq.f32.partialorder %v1448_v53, 8.507059e+37  ;;  %v1451_v5 = vor.u32 1.1754944e-38, %v1450_v54 }
 0x2f0   :  { %v2472_v48 = vadd.f32 1.0, %v2246_v44  ;;  %v1359_v50 = vadd.f32 %v1358_v43, %v929_v40 }
 0x2f1   :  { %2251 = vrcp.f32 %v2470_v45  ;;  %v2087_v0 = vmul.f32 -1.442695, %v1346_v49  ;;  %v1403_v16 = vand.u32 2147483647, %v2470_v45  ;;  %v1405_v17 = vand.u32 2147483648, %v2470_v45 }
 0x2f2   :  { %v2248_v52 = vpop.eup %2247  ;;  %2253 = vrcp.f32 %v2472_v48  ;;  %v2088_v1 = vmul.f32 -1.442695, %v1359_v50  ;;  %v1420_v24 = vand.u32 2147483648, %v2472_v48  ;;  %v1418_v33 = vand.u32 2147483647, %v2472_v48 }
 0x2f3   :  { %v2250_v55 = vpop.eup %2249  ;;  %v1425_v56 = vmul.f32 %v2248_v52, %v1388_v35  ;;  %v1319_v57 = vpop.f32.mrf.mxu2  ;;  %vm1430_vm7 = vweird.f32 %v2248_v52  ;;  %2255 = vpow2.f32 %v2087_v0  ;;  %vm1399_vm13 = vweird.f32 %v2470_v45 }
 0x2f4   :  { %v1332_v58 = vpop.f32.mrf.mxu3  ;;  %v1440_v62 = vmul.f32 %v2250_v55, %v2465_v36  ;;  %v1320_v2 = vadd.f32 %v1319_v57, %v926_v51  ;;  %vm1445_vm8 = vweird.f32 %v2250_v55  ;;  %2257 = vpow2.f32 %v2088_v1  ;;  %vm1431_vm9 = vmor %vm1429_vm3, %vm1430_vm7 }
 0x2f5   :  { %v1426_v63 = vsub.f32 1.0, %v1425_v56  ;;  %v1333_v6 = vadd.f32 %v1332_v58, %v927_v59  ;;  %vm1446_vm10 = vmor %vm1444_vm5, %vm1445_vm8  ;;  %v1406_v38 = vor.u32 1.1754944e-38, %v1405_v17  ;;  %vm1414_vm15 = vweird.f32 %v2472_v48 }
 0x2f6   :  { %v1441_v3 = vsub.f32 1.0, %v1440_v62  ;;  %v1347_v7 = vpop.f32.mrf.mxu1  ;;  %v2085_v11 = vmul.f32 -1.442695, %v1320_v2  ;;  %vm1404_vm0 = vcmp.eq.f32.partialorder %v1403_v16, 8.507059e+37  ;;  %v1421_v43 = vor.u32 1.1754944e-38, %v1420_v24 }
 0x2f7   :  { %v1360_v8 = vpop.f32.mrf.mxu0  ;;  %v2252_v9 = vpop.eup %2251  ;;  %v1427_v10 = vmul.f32 %v2248_v52, %v1426_v63  ;;  %v2086_v21 = vmul.f32 -1.442695, %v1333_v6  ;;  %vm1419_vm2 = vcmp.eq.f32.partialorder %v1418_v33, 8.507059e+37 }
 0x2f8   :  { %v2254_v12 = vpop.eup %2253  ;;  %v1442_v13 = vmul.f32 %v2250_v55, %v1441_v3  ;;  %v1395_v14 = vmul.f32 %v2252_v9, %v2470_v45  ;;  %2259 = vpow2.f32 %v2085_v11  ;;  %vm1400_vm11 = vweird.f32 %v2252_v9 }
 0x2f9   :  { %v1428_v15 = vadd.f32 %v2248_v52, %v1427_v10  ;;  %v1410_v18 = vmul.f32 %v2254_v12, %v2472_v48  ;;  %2261 = vpow2.f32 %v2086_v21  ;;  %v2256_v30 = vpop.eup %2255  ;;  %vm1415_vm12 = vweird.f32 %v2254_v12  ;;  %vm1401_vm14 = vmor %vm1399_vm13, %vm1400_vm11 }
 0x2fa   :  { %v1443_v19 = vadd.f32 %v2250_v55, %v1442_v13  ;;  %v1396_v20 = vsub.f32 1.0, %v1395_v14  ;;  %v2258_v34 = vpop.eup %2257  ;;  %v1392_v37 = vadd.f32 1.0, %v2256_v30  ;;  %vm1416_vm1 = vmor %vm1414_vm15, %vm1415_vm12 }
 0x2fb   :  { %v1432_v22 = vsel %vm1431_vm9, %v2248_v52, %v1428_v15  ;;  %v1411_v23 = vsub.f32 1.0, %v1410_v18  ;;  %v1321_v25 = vpop.f32.mrf.mxu2  ;;  %v1393_v40 = vadd.f32 1.0, %v2258_v34 }
 0x2fc   :  { %v1334_v26 = vpop.f32.mrf.mxu3  ;;  %v1437_v27 = vsel %vm2480_vm4, %v1436_v61, %v1432_v22  ;;  %v1447_v28 = vsel %vm1446_vm10, %v2250_v55, %v1443_v19  ;;  %v1397_v29 = vmul.f32 %v2252_v9, %v1396_v20  ;;  %2263 = vrcp.f32 %v1392_v37 }
 0x2fd   :  { %v1452_v31 = vsel %vm2486_vm6, %v1451_v5, %v1447_v28  ;;  %v1412_v32 = vmul.f32 %v2254_v12, %v1411_v23  ;;  %2265 = vrcp.f32 %v1393_v40  ;;  %v1493_v54 = vand.u32 2147483647, %v1392_v37 }
 0x2fe   :  { %v1515_v35 = vpack.c.bf16 %v1452_v31, %v1437_v27  ;;  %v1398_v36 = vadd.f32 %v2252_v9, %v1397_v29  ;;  %v2260_v41 = vpop.eup %2259  ;;  %v1495_v56 = vand.u32 2147483648, %v1392_v37  ;;  %v1508_v57 = vand.u32 2147483647, %v1393_v40 }
 0x2ff   :  { %v1413_v39 = vadd.f32 %v2254_v12, %v1412_v32  ;;  %v2262_v46 = vpop.eup %2261  ;;  %v1390_v48 = vadd.f32 1.0, %v2260_v41  ;;  %v1510_v60 = vand.u32 2147483648, %v1393_v40  ;;  %vm1489_vm3 = vweird.f32 %v1392_v37 }
 0x300   :  { %1519 = vst [vmem:[%s2542_s11 + $0x8] sm:$0xff] %v1515_v35  ;;  %v1402_v42 = vsel %vm1401_vm14, %v2252_v9, %v1398_v36  ;;  %v1391_v50 = vadd.f32 1.0, %v2262_v46  ;;  %vm2513_vm5 = vcmp.eq.f32.partialorder %v1493_v54, 8.507059e+37  ;;  %vm1504_vm6 = vweird.f32 %v1393_v40 }
 0x301   :  { %v1407_v44 = vsel %vm1404_vm0, %v1406_v38, %v1402_v42  ;;  %v1417_v45 = vsel %vm1416_vm1, %v2254_v12, %v1413_v39  ;;  %2267 = vrcp.f32 %v1390_v48  ;;  %v1496_v4 = vor.u32 1.1754944e-38, %v1495_v56 }
 0x302   :  { %v1422_v47 = vsel %vm1419_vm2, %v1421_v43, %v1417_v45  ;;  %v2264_v51 = vpop.eup %2263  ;;  %2269 = vrcp.f32 %v1391_v50  ;;  %vm2517_vm8 = vcmp.eq.f32.partialorder %v1508_v57, 8.507059e+37  ;;  %v1511_v8 = vor.u32 1.1754944e-38, %v1510_v60 }
 0x303   :  { %v1514_v49 = vpack.c.bf16 %v1422_v47, %v1407_v44  ;;  %v2266_v52 = vpop.eup %2265  ;;  %v1485_v53 = vmul.f32 %v2264_v51, %v1392_v37  ;;  %vm1490_vm4 = vweird.f32 %v2264_v51  ;;  %v1463_v10 = vand.u32 2147483647, %v1390_v48 }
 0x304   :  { %v1500_v59 = vmul.f32 %v2266_v52, %v1393_v40  ;;  %vm1505_vm7 = vweird.f32 %v2266_v52  ;;  %vm1491_vm9 = vmor %vm1489_vm3, %vm1490_vm4  ;;  %v1465_v12 = vand.u32 2147483648, %v1390_v48  ;;  %v1480_v14 = vand.u32 2147483648, %v1391_v50 }
 0x305   :  { %1518 = vst [vmem:[%s2542_s11] sm:$0xff] %v1514_v49  ;;  %v1486_v55 = vsub.f32 1.0, %v1485_v53  ;;  %vm1506_vm10 = vmor %vm1504_vm6, %vm1505_vm7  ;;  %v1478_v20 = vand.u32 2147483647, %v1391_v50  ;;  %vm1459_vm13 = vweird.f32 %v1390_v48  ;;  %vm1474_vm15 = vweird.f32 %v1391_v50 }
 0x306   :  { %v1501_v58 = vsub.f32 1.0, %v1500_v59  ;;  %v1466_v23 = vor.u32 1.1754944e-38, %v1465_v12  ;;  %vm1464_vm0 = vcmp.eq.f32.partialorder %v1463_v10, 8.507059e+37  ;;  %v1481_v26 = vor.u32 1.1754944e-38, %v1480_v14 }
 0x307   :  { %v2268_v61 = vpop.eup %2267  ;;  %v1487_v62 = vmul.f32 %v2264_v51, %v1486_v55  ;;  %vm1479_vm2 = vcmp.eq.f32.partialorder %v1478_v20, 8.507059e+37 }
 0x308   :  { %v2270_v0 = vpop.eup %2269  ;;  %v1502_v1 = vmul.f32 %v2266_v52, %v1501_v58  ;;  %v1455_v2 = vmul.f32 %v2268_v61, %v1390_v48  ;;  %vm1460_vm11 = vweird.f32 %v2268_v61 }
 0x309   :  { %v1488_v3 = vadd.f32 %v2264_v51, %v1487_v62  ;;  %v1470_v6 = vmul.f32 %v2270_v0, %v1391_v50  ;;  %vm1475_vm12 = vweird.f32 %v2270_v0  ;;  %vm1461_vm14 = vmor %vm1459_vm13, %vm1460_vm11 }
 0x30a   :  { %v1503_v7 = vadd.f32 %v2266_v52, %v1502_v1  ;;  %v1456_v9 = vsub.f32 1.0, %v1455_v2  ;;  %vm1476_vm1 = vmor %vm1474_vm15, %vm1475_vm12 }
 0x30b   :  { %v1492_v11 = vsel %vm1491_vm9, %v2264_v51, %v1488_v3  ;;  %v1471_v13 = vsub.f32 1.0, %v1470_v6 }
 0x30c   :  { %v1497_v15 = vsel %vm2513_vm5, %v1496_v4, %v1492_v11  ;;  %v1507_v16 = vsel %vm1506_vm10, %v2266_v52, %v1503_v7  ;;  %v1457_v17 = vmul.f32 %v2268_v61, %v1456_v9 }
 0x30d   :  { %v1512_v18 = vsel %vm2517_vm8, %v1511_v8, %v1507_v16  ;;  %v1472_v19 = vmul.f32 %v2270_v0, %v1471_v13 }
 0x30e   :  { %v1517_v21 = vpack.c.bf16 %v1512_v18, %v1497_v15  ;;  %v1458_v22 = vadd.f32 %v2268_v61, %v1457_v17 }
 0x30f   :  { %v1473_v24 = vadd.f32 %v2270_v0, %v1472_v19 }
 0x310   :  { %1521 = vst [vmem:[%s2542_s11 + $0x18] sm:$0xff] %v1517_v21  ;;  %v1462_v25 = vsel %vm1461_vm14, %v2268_v61, %v1458_v22 }
 0x311   :  { %v1467_v27 = vsel %vm1464_vm0, %v1466_v23, %v1462_v25  ;;  %v1477_v28 = vsel %vm1476_vm1, %v2270_v0, %v1473_v24 }
 0x312   :  { %v1482_v29 = vsel %vm1479_vm2, %v1481_v26, %v1477_v28 }
 0x313   :  { %v1516_v30 = vpack.c.bf16 %v1482_v29, %v1467_v27 }
 0x315   :  { %1520 = vst [vmem:[%s2542_s11 + $0x10] sm:$0xff] %v1516_v30 }
 0x316   :  { %1530 = vsyncpa [#allocation3], 1 }
 0x317   :  { %1531 = vsyncpa [#allocation5], 1 }

</bundles_post_ra>
